<compile_context>
chip_gen: v6e
topology: v6e:2x2x1
jax: 0.10.0
libtpu: 0.0.40
codegen_flags: <defaults>
</compile_context>

<pallas_src>
import jax
import jax.numpy as jnp
from jax.experimental import pallas as pl
from jax.experimental.pallas import tpu as pltpu

_LANE = 128


def _relu_kernel(x_ref, o_ref):
    # elementwise hot path: clamp(min=0) on the whole VMEM tile
    o_ref[...] = jnp.maximum(x_ref[...], jnp.zeros((), x_ref.dtype))


def _pick_width(n, max_width=4096):
    """Widest multiple of 128 (<= max_width) that divides n; 0 if none."""
    for w_cand in range(max_width, 0, -_LANE):
        if n % w_cand == 0:
            return w_cand
    return 0


def _chip_tuning():
    """Return (target_block_bytes, vmem_limit_bytes) for the local TPU gen.

    v7x: 8 MiB blocks (in+out double-buffered ~= 32 MiB, < 64 MiB physical VMEM)
    v6e: 4 MiB blocks (~16 MiB double-buffered, well inside VMEM)
    v5e / unknown: 2 MiB blocks (~8 MiB double-buffered, under the 16 MiB
                   default scoped-VMEM limit)
    """
    kind = ""
    try:
        kind = jax.devices()[0].device_kind.lower()
    except Exception:
        pass
    if "v7" in kind or "7x" in kind:
        return 8 << 20, 40 << 20
    if "v6" in kind:
        return 4 << 20, 24 << 20
    return 2 << 20, 12 << 20


def _relu_2d(x2d, rows, w, dtype, itemsize, sublane, inplace):
    """Run the Pallas ReLU kernel on a lane-dense (rows, w) slab."""
    target_block_bytes, vmem_limit = _chip_tuning()
    total_bytes = rows * w * itemsize
    n = rows * w

    target_rows = max(1, target_block_bytes // (w * itemsize))

    # Never run a 1-step grid on tensors > ~256 KiB: >=2 (ideally >=4) blocks
    # keep the writeback of block i overlapped with the input DMA of block i+1
    # and give both v7x TensorCores work on the "parallel" row axis.
    if total_bytes > (256 << 10) and rows >= 2 * sublane:
        min_steps = 4 if rows >= 4 * sublane else 2
        cap = max(sublane, (rows // min_steps // sublane) * sublane)
        target_rows = min(target_rows, cap)

    if target_rows >= rows:
        block_rows = rows  # single block covering the full (possibly odd) row axis
    else:
        block_rows = max(sublane, (target_rows // sublane) * sublane)
        # Prefer a sublane-aligned block that divides rows evenly (no masked
        # partial last block), as long as it stays within ~2x of the target.
        lo = max(sublane, block_rows // 2)
        for cand in range(block_rows, lo - 1, -sublane):
            if rows % cand == 0:
                block_rows = cand
                break

    grid = (pl.cdiv(rows, block_rows),)

    kwargs = {}
    if inplace:
        # Halves peak HBM footprint; caller must not reuse x afterwards
        # (donate x at the jit boundary for a true in-place update).
        kwargs["input_output_aliases"] = {0: 0}

    return pl.pallas_call(
        _relu_kernel,
        out_shape=jax.ShapeDtypeStruct((rows, w), dtype),
        grid=grid,
        in_specs=[pl.BlockSpec((block_rows, w), lambda i: (i, 0))],
        out_specs=pl.BlockSpec((block_rows, w), lambda i: (i, 0)),
        compiler_params=pltpu.CompilerParams(
            dimension_semantics=("parallel",),
            vmem_limit_bytes=vmem_limit,
        ),
        cost_estimate=pl.CostEstimate(
            flops=n, transcendentals=0, bytes_accessed=2 * n * itemsize
        ),
        **kwargs,
    )(x2d)


def pallas_relu(x, *, inplace=False):
    """ReLU forward (== torch clamp(min=0)). Any shape / dtype with a max().

    The `packbits` argument of the PyTorch module only changes what is saved
    for backward (bit-packed activation mask); the forward output is identical,
    so only the clamp is implemented here.
    """
    orig_shape = x.shape
    dtype = x.dtype
    n = x.size
    if n == 0:
        return x

    itemsize = jnp.dtype(dtype).itemsize
    sublane = max(8, 32 // itemsize)  # 8 for f32, 16 for bf16, 32 for int8/fp8

    x_flat = x.reshape(-1)

    # Fast path: a wide lane dimension that divides n exactly -> metadata-only
    # reshapes in the wrapper (no pad pass, no output slice pass).
    w = _pick_width(n)
    if w != 0:
        rows = n // w
        out2d = _relu_2d(
            x_flat.reshape(rows, w), rows, w, dtype, itemsize, sublane, inplace
        )
        return out2d.reshape(orig_shape)

    # Rare fallback: n is not a multiple of 128.  Run the kernel on the
    # 128-aligned bulk and clamp the <128-element tail in plain JAX; this
    # avoids the full-tensor jnp.pad + output-slice passes of a pad fallback.
    # TODO(synk): a fully copy-free variant would pass n via SMEM and mask the
    # last block inside the kernel instead of slicing/concatenating.
    n_bulk = (n // _LANE) * _LANE
    if n_bulk == 0:
        return jnp.maximum(x, jnp.zeros((), dtype))
    wb = _pick_width(n_bulk)
    rows = n_bulk // wb
    bulk = _relu_2d(
        x_flat[:n_bulk].reshape(rows, wb), rows, wb, dtype, itemsize, sublane, False
    )
    tail = jnp.maximum(x_flat[n_bulk:], jnp.zeros((), dtype))
    return jnp.concatenate([bulk.reshape(-1), tail]).reshape(orig_shape)


class ReLU:
    """Mirror of the PyTorch ReLU module (forward only)."""

    def __init__(self, packbits=True):
        # TODO(synk): packbits only affects the saved-for-backward tensor
        # (bit-packed activation mask); forward output is unaffected.
        self.packbits = packbits

    def __call__(self, x):
        return pallas_relu(x)


if __name__ == "__main__":
    key = jax.random.PRNGKey(0)
    # NCHW input, small shape consistent with the PyTorch module
    x = jax.random.normal(key, (2, 4, 16, 16), dtype=jnp.float32)

    mod = ReLU(packbits=True)
    out = jax.block_until_ready(mod(x))

    ref = jnp.maximum(x, 0.0)
    assert out.shape == x.shape and out.dtype == x.dtype
    assert jnp.allclose(out, ref), "mismatch vs reference"

    # also exercise the non-128-multiple fallback path once
    key2 = jax.random.PRNGKey(1)
    y = jax.random.normal(key2, (5, 37), dtype=jnp.float32)  # 185 elems, bulk=128
    out_y = jax.block_until_ready(pallas_relu(y))
    assert jnp.allclose(out_y, jnp.maximum(y, 0.0)), "fallback mismatch"

    print("KERNEL_OK")
</pallas_src>

<mosaic_0001>
module attributes {stable_mosaic.version = 11 : i64} {
  func.func @_relu_kernel(%arg0: i32, %arg1: memref<1x2048xf32, #tpu.memory_space<vmem>>, %arg2: memref<1x2048xf32, #tpu.memory_space<vmem>>) attributes {dimension_semantics = [#tpu.dimension_semantics<parallel>], iteration_bounds = array<i64: 1>, scalar_prefetch = 0 : i64, scratch_operands = 0 : i64, tpu.core_type = #tpu.core_type<tc>, window_params = [{transform_indices = @transform_0, window_bounds = array<i64: 1, 2048>}, {transform_indices = @transform_1, window_bounds = array<i64: 1, 2048>}]} {
    %c0 = arith.constant 0 : index
    %c0_0 = arith.constant 0 : index
    %0 = vector.load %arg1[%c0, %c0_0] : memref<1x2048xf32, #tpu.memory_space<vmem>>, vector<1x2048xf32>
    %cst = arith.constant 0.000000e+00 : f32
    %1 = vector.broadcast %cst : f32 to vector<1x2048xf32>
    %2 = arith.maximumf %0, %1 : vector<1x2048xf32>
    %c0_1 = arith.constant 0 : index
    %c0_2 = arith.constant 0 : index
    %3 = vector.load %arg2[%c0_1, %c0_2] : memref<1x2048xf32, #tpu.memory_space<vmem>>, vector<1x2048xf32>
    tpu.vector_store %arg2[%c0_1, %c0_2], %2 {strides = array<i32>} : memref<1x2048xf32, #tpu.memory_space<vmem>>, vector<1x2048xf32>,
    return
  }
  func.func @transform_0(%arg0: i32) -> (i32, i32) {
    %c0_i32 = arith.constant 0 : i32
    %c0_i32_0 = arith.constant 0 : i32
    return %arg0, %c0_i32 : i32, i32
  }
  func.func @transform_1(%arg0: i32) -> (i32, i32) {
    %c0_i32 = arith.constant 0 : i32
    %c0_i32_0 = arith.constant 0 : i32
    return %arg0, %c0_i32 : i32, i32
  }
}

</mosaic_0001>

<bundles_post_ra>
// kernel: tpu_custom_call.1
= control target key start
LH: loop header
LB: loop body
LE: loop exit
PB: predicated region body
PF: predicated region fallthrough
CT: control target
= control target key end

     0   :  { %6 = vsyncpa [#allocation3], 0  ;;  %s106_s0 = inlined_call_operand.hbm [shape: f32[1,2048], index: 0, kind: input, shape index: {}]   ;;  %s107_s1 = inlined_call_operand.hbm [shape: f32[1,2048], index: 1, kind: output, shape index: {}]  }
   0x1   :  { %7 = vsyncpa [#allocation4], 0  ;;  %s88_s6 = smov [#allocation2]  }
   0x2   :  { %s14_s7 = sshll.u32 %s88_s6, 4  ;;  %s15_s7 = int_to_ptr.vmem [resolvable:$true] %s14_s7 }
   0x3   :  { %s52_s8 = scalar_lea.vmem %s15_s7, 256  ;;  %p57_p1 = scmp.lt.s32.totalorder %s15_s7, %s15_s7 }
   0x4   :  { %p53_p0 = scmp.ne.s32.totalorder %s15_s7, %s52_s8  ;;  %p58_p2 = scmp.lt.s32.totalorder %s52_s8, %s52_s8 }
   0x6   :  { %p59_p3 = por %p58_p2, %p57_p1 }
   0x8   :  { %p60_p4 = pnand %p59_p3, %p53_p0 }
   0xa   :  { %63 = shalt.err (!%p60_p4)
}
   0xb   :  { %17 = dma.hbm_to_vmem [thread:$0]  %s106_s0, 256, %s15_s7, [#allocation3]  }
   0xc   :  { %84 = dma.done.wait [#allocation3], 256  }
   0xd   :  { %85 = vsyncadd [#allocation3], 4294967040  ;;  %s89_s11 = smov [#allocation5]   ;;  %v21_v0 = vld [vmem:[#allocation2] sm:$0xff]  ;;  %v22_v1 = vld [vmem:[#allocation2 + $0x8] sm:$0xff] }
   0xe   :  { %s33_s12 = sshll.u32 %s89_s11, 4  ;;  %v23_v2 = vmax.f32 %v21_v0, 0.0  ;;  %v24_v3 = vmax.f32 %v22_v1, 0.0  ;;  %s34_s12 = int_to_ptr.vmem [resolvable:$true] %s33_s12 }
   0xf   :  { %s64_s13 = scalar_lea.vmem %s34_s12, 256  ;;  %p69_p6 = scmp.lt.s32.totalorder %s34_s12, %s34_s12 }
  0x10   :  { %25 = vst [vmem:[#allocation5] sm:$0xff] %v23_v2  ;;  %26 = vst [vmem:[#allocation5 + $0x8] sm:$0xff] %v24_v3  ;;  %p65_p5 = scmp.ne.s32.totalorder %s34_s12, %s64_s13  ;;  %p70_p7 = scmp.lt.s32.totalorder %s64_s13, %s64_s13 }
  0x12   :  { %p71_p8 = por %p70_p7, %p69_p6 }
  0x14   :  { %p72_p9 = pnand %p71_p8, %p65_p5 }
  0x16   :  { %75 = shalt.err (!%p72_p9)
}
  0x17   :  { %36 = dma.vmem_to_hbm [thread:$0]  %s34_s12, 256, %s107_s1, [#allocation4]  }
  0x18   :  { %86 = dma.done.wait [#allocation4], 256  }
  0x19   :  { %87 = vsyncadd [#allocation4], 4294967040 }
  0x1a   :  { %40 = vsyncpa [#allocation3], 1 }
  0x1b   :  { %41 = vsyncpa [#allocation4], 1 }

</bundles_post_ra>
